<compile_context>
chip_gen: v7x
topology: tpu7x:2x2x1
jax: 0.10.0
libtpu: 0.0.40
codegen_flags: <defaults>
</compile_context>

<pallas_src>
import jax
import jax.numpy as jnp
from jax.experimental import pallas as pl
from jax.experimental.pallas import tpu as pltpu

latent_dim = 10
hidden1 = 128
hidden2 = 256
output_dim = 64

PAD_OUT = 128      # output_dim (64) zero-padded to a full lane width (unmasked vst)
TILE_B_MAX = 2048  # large batch tiles amortize per-grid-step overhead


def _round_up(x, m):
    return (x + m - 1) // m * m


def _cdiv(a, b):
    return -(-a // b)


def _choose_tiling(B):
    """Balanced batch tiles; >= 2 (even) grid steps when B > 64 for v7x's 2 TCs."""
    num_tiles = max(1, _cdiv(B, TILE_B_MAX))
    if B > 64:
        num_tiles = max(num_tiles, 2)
        if num_tiles % 2:
            num_tiles += 1
    tile_b = _round_up(_cdiv(B, num_tiles), 16)  # 16: bf16 sublane packing
    return tile_b, num_tiles


def generator_kernel(z_ref, w1_ref, b1_ref, w2_ref, b2_ref, w3_ref, b3_ref, o_ref):
    # Linear 1 + ReLU  (bf16 MXU operands, f32 accumulate, f32 epilogue)
    h1 = jnp.dot(z_ref[...], w1_ref[...], preferred_element_type=jnp.float32) + b1_ref[...]
    h1 = jnp.maximum(h1, 0.0)
    # Linear 2 + ReLU
    h2 = jnp.dot(h1.astype(jnp.bfloat16), w2_ref[...],
                 preferred_element_type=jnp.float32) + b2_ref[...]
    h2 = jnp.maximum(h2, 0.0)
    # Linear 3 + Tanh
    h3 = jnp.dot(h2.astype(jnp.bfloat16), w3_ref[...],
                 preferred_element_type=jnp.float32) + b3_ref[...]
    o_ref[...] = jnp.tanh(h3).astype(o_ref.dtype)


@jax.jit
def generator_forward(z, params):
    w1, b1, w2, b2, w3, b3 = params
    B, d_in = z.shape
    pad_out = w3.shape[1]

    tile_b, num_tiles = _choose_tiling(B)
    B_pad = tile_b * num_tiles

    # Only the batch axis is padded (<= 15 rows per tile); latent dim stays at 10.
    z_bf16 = jnp.zeros((B_pad, d_in), jnp.bfloat16).at[:B].set(z.astype(jnp.bfloat16))

    out = pl.pallas_call(
        generator_kernel,
        out_shape=jax.ShapeDtypeStruct((B_pad, pad_out), jnp.bfloat16),
        grid=(num_tiles,),
        in_specs=[
            pl.BlockSpec((tile_b, d_in), lambda i: (i, 0)),   # z: tiled over batch
            pl.BlockSpec(w1.shape, lambda i: (0, 0)),         # weights/biases resident
            pl.BlockSpec(b1.shape, lambda i: (0, 0)),
            pl.BlockSpec(w2.shape, lambda i: (0, 0)),
            pl.BlockSpec(b2.shape, lambda i: (0, 0)),
            pl.BlockSpec(w3.shape, lambda i: (0, 0)),
            pl.BlockSpec(b3.shape, lambda i: (0, 0)),
        ],
        out_specs=pl.BlockSpec((tile_b, pad_out), lambda i: (i, 0)),
        compiler_params=pltpu.CompilerParams(
            dimension_semantics=("parallel",),
            vmem_limit_bytes=32 * 1024 * 1024,
        ),
    )(z_bf16, w1, b1, w2, b2, w3, b3)

    # Strip batch padding + output lane padding; return f32 like the nn.Module.
    return out[:B, :output_dim].astype(jnp.float32)


def init_params(key):
    # PyTorch-style uniform(-1/sqrt(fan_in), 1/sqrt(fan_in)) on the real dims.
    # Only the final layer's output dim is lane-padded (64 -> 128).
    # Weights stored bf16 (MXU operands), biases f32 (epilogue stays f32).
    ks = jax.random.split(key, 6)

    def lin(kw, kb, fan_in, fan_out, pad_out):
        bound = 1.0 / float(fan_in) ** 0.5
        w = jax.random.uniform(kw, (fan_in, fan_out), jnp.float32, -bound, bound)
        b = jax.random.uniform(kb, (fan_out,), jnp.float32, -bound, bound)
        w_pad = jnp.zeros((fan_in, pad_out), jnp.float32).at[:, :fan_out].set(w)
        b_pad = jnp.zeros((1, pad_out), jnp.float32).at[0, :fan_out].set(b)
        return w_pad.astype(jnp.bfloat16), b_pad

    w1, b1 = lin(ks[0], ks[1], latent_dim, hidden1, hidden1)
    w2, b2 = lin(ks[2], ks[3], hidden1, hidden2, hidden2)
    w3, b3 = lin(ks[4], ks[5], hidden2, output_dim, PAD_OUT)
    return (w1, b1, w2, b2, w3, b3)


def reference_forward(z, params):
    # Same math as the kernel (bf16 dot operands, f32 accumulate/epilogue).
    w1, b1, w2, b2, w3, b3 = params
    zb = z.astype(jnp.bfloat16)
    h1 = jnp.maximum(
        jnp.dot(zb, w1, preferred_element_type=jnp.float32) + b1, 0.0)
    h2 = jnp.maximum(
        jnp.dot(h1.astype(jnp.bfloat16), w2, preferred_element_type=jnp.float32) + b2, 0.0)
    h3 = jnp.dot(h2.astype(jnp.bfloat16), w3, preferred_element_type=jnp.float32) + b3
    return jnp.tanh(h3)[:, :output_dim]


if __name__ == "__main__":
    key = jax.random.PRNGKey(0)
    kz, kz2, kp = jax.random.split(key, 3)
    params = init_params(kp)

    # Small single-tile case (B=8).
    z = jax.random.normal(kz, (8, latent_dim), jnp.float32)
    out = jax.block_until_ready(generator_forward(z, params))
    ref = reference_forward(z, params)
    assert out.shape == (8, output_dim)
    assert jnp.allclose(out, ref, atol=2e-2, rtol=2e-2)

    # Multi-tile case exercising the batch grid (>= 2 grid steps, modest padding).
    z2 = jax.random.normal(kz2, (520, latent_dim), jnp.float32)
    out2 = jax.block_until_ready(generator_forward(z2, params))
    ref2 = reference_forward(z2, params)
    assert out2.shape == (520, output_dim)
    assert jnp.allclose(out2, ref2, atol=2e-2, rtol=2e-2)

    print("KERNEL_OK")
</pallas_src>

<mosaic_0001>
module attributes {stable_mosaic.version = 11 : i64} {
  func.func @generator_kernel(%arg0: i32, %arg1: memref<16x10xbf16, #tpu.memory_space<vmem>>, %arg2: memref<10x128xbf16, #tpu.memory_space<vmem>>, %arg3: memref<1x128xf32, #tpu.memory_space<vmem>>, %arg4: memref<128x256xbf16, #tpu.memory_space<vmem>>, %arg5: memref<1x256xf32, #tpu.memory_space<vmem>>, %arg6: memref<256x128xbf16, #tpu.memory_space<vmem>>, %arg7: memref<1x128xf32, #tpu.memory_space<vmem>>, %arg8: memref<16x128xbf16, #tpu.memory_space<vmem>>) attributes {dimension_semantics = [#tpu.dimension_semantics<parallel>], iteration_bounds = array<i64: 1>, scalar_prefetch = 0 : i64, scratch_operands = 0 : i64, tpu.core_type = #tpu.core_type<tc>, window_params = [{transform_indices = @transform_0, window_bounds = array<i64: 16, 10>}, {pipeline_mode = #tpu.pipeline_mode<synchronous>, transform_indices = @transform_1, window_bounds = array<i64: 10, 128>}, {pipeline_mode = #tpu.pipeline_mode<synchronous>, transform_indices = @transform_2, window_bounds = array<i64: 1, 128>}, {pipeline_mode = #tpu.pipeline_mode<synchronous>, transform_indices = @transform_3, window_bounds = array<i64: 128, 256>}, {pipeline_mode = #tpu.pipeline_mode<synchronous>, transform_indices = @transform_4, window_bounds = array<i64: 1, 256>}, {pipeline_mode = #tpu.pipeline_mode<synchronous>, transform_indices = @transform_5, window_bounds = array<i64: 256, 128>}, {pipeline_mode = #tpu.pipeline_mode<synchronous>, transform_indices = @transform_6, window_bounds = array<i64: 1, 128>}, {transform_indices = @transform_7, window_bounds = array<i64: 16, 128>}]} {
    %c0 = arith.constant 0 : index
    %c0_0 = arith.constant 0 : index
    %0 = vector.load %arg1[%c0, %c0_0] : memref<16x10xbf16, #tpu.memory_space<vmem>>, vector<16x10xbf16>
    %c0_1 = arith.constant 0 : index
    %c0_2 = arith.constant 0 : index
    %1 = vector.load %arg2[%c0_1, %c0_2] : memref<10x128xbf16, #tpu.memory_space<vmem>>, vector<10x128xbf16>
    %cst = arith.constant dense<0.000000e+00> : vector<16x128xf32>
    %2 = tpu.matmul %0, %1, %cst {dimension_numbers = #tpu.dot_dimension_numbers<[1], [0], [0], [1], [0, 0, 1, 1], [], []>} : vector<16x10xbf16>, vector<10x128xbf16>, vector<16x128xf32> -> vector<16x128xf32>
    %c0_3 = arith.constant 0 : index
    %c0_4 = arith.constant 0 : index
    %3 = vector.load %arg3[%c0_3, %c0_4] : memref<1x128xf32, #tpu.memory_space<vmem>>, vector<1x128xf32>
    %4 = vector.broadcast %3 : vector<1x128xf32> to vector<16x128xf32>
    %5 = arith.addf %2, %4 : vector<16x128xf32>
    %cst_5 = arith.constant 0.000000e+00 : f32
    %6 = vector.broadcast %cst_5 : f32 to vector<16x128xf32>
    %7 = arith.maximumf %5, %6 : vector<16x128xf32>
    %8 = arith.truncf %7 : vector<16x128xf32> to vector<16x128xbf16>
    %c0_6 = arith.constant 0 : index
    %c0_7 = arith.constant 0 : index
    %9 = vector.load %arg4[%c0_6, %c0_7] : memref<128x256xbf16, #tpu.memory_space<vmem>>, vector<128x256xbf16>
    %cst_8 = arith.constant dense<0.000000e+00> : vector<16x256xf32>
    %10 = tpu.matmul %8, %9, %cst_8 {dimension_numbers = #tpu.dot_dimension_numbers<[1], [0], [0], [1], [0, 0, 1, 1], [], []>} : vector<16x128xbf16>, vector<128x256xbf16>, vector<16x256xf32> -> vector<16x256xf32>
    %c0_9 = arith.constant 0 : index
    %c0_10 = arith.constant 0 : index
    %11 = vector.load %arg5[%c0_9, %c0_10] : memref<1x256xf32, #tpu.memory_space<vmem>>, vector<1x256xf32>
    %12 = vector.broadcast %11 : vector<1x256xf32> to vector<16x256xf32>
    %13 = arith.addf %10, %12 : vector<16x256xf32>
    %cst_11 = arith.constant 0.000000e+00 : f32
    %14 = vector.broadcast %cst_11 : f32 to vector<16x256xf32>
    %15 = arith.maximumf %13, %14 : vector<16x256xf32>
    %16 = arith.truncf %15 : vector<16x256xf32> to vector<16x256xbf16>
    %c0_12 = arith.constant 0 : index
    %c0_13 = arith.constant 0 : index
    %17 = vector.load %arg6[%c0_12, %c0_13] : memref<256x128xbf16, #tpu.memory_space<vmem>>, vector<256x128xbf16>
    %cst_14 = arith.constant dense<0.000000e+00> : vector<16x128xf32>
    %18 = tpu.matmul %16, %17, %cst_14 {dimension_numbers = #tpu.dot_dimension_numbers<[1], [0], [0], [1], [0, 0, 1, 1], [], []>} : vector<16x256xbf16>, vector<256x128xbf16>, vector<16x128xf32> -> vector<16x128xf32>
    %c0_15 = arith.constant 0 : index
    %c0_16 = arith.constant 0 : index
    %19 = vector.load %arg7[%c0_15, %c0_16] : memref<1x128xf32, #tpu.memory_space<vmem>>, vector<1x128xf32>
    %20 = vector.broadcast %19 : vector<1x128xf32> to vector<16x128xf32>
    %21 = arith.addf %18, %20 : vector<16x128xf32>
    %22 = math.tanh %21 : vector<16x128xf32>
    %23 = arith.truncf %22 : vector<16x128xf32> to vector<16x128xbf16>
    %c0_17 = arith.constant 0 : index
    %c0_18 = arith.constant 0 : index
    %24 = vector.load %arg8[%c0_17, %c0_18] : memref<16x128xbf16, #tpu.memory_space<vmem>>, vector<16x128xbf16>
    tpu.vector_store %arg8[%c0_17, %c0_18], %23 {strides = array<i32>} : memref<16x128xbf16, #tpu.memory_space<vmem>>, vector<16x128xbf16>,
    return
  }
  func.func @transform_0(%arg0: i32) -> (i32, i32) {
    %c0_i32 = arith.constant 0 : i32
    %c0_i32_0 = arith.constant 0 : i32
    return %arg0, %c0_i32 : i32, i32
  }
  func.func @transform_1(%arg0: i32) -> (i32, i32) {
    %c0_i32 = arith.constant 0 : i32
    %c0_i32_0 = arith.constant 0 : i32
    %c0_i32_1 = arith.constant 0 : i32
    return %c0_i32, %c0_i32_0 : i32, i32
  }
  func.func @transform_2(%arg0: i32) -> (i32, i32) {
    %c0_i32 = arith.constant 0 : i32
    %c0_i32_0 = arith.constant 0 : i32
    %c0_i32_1 = arith.constant 0 : i32
    return %c0_i32, %c0_i32_0 : i32, i32
  }
  func.func @transform_3(%arg0: i32) -> (i32, i32) {
    %c0_i32 = arith.constant 0 : i32
    %c0_i32_0 = arith.constant 0 : i32
    %c0_i32_1 = arith.constant 0 : i32
    return %c0_i32, %c0_i32_0 : i32, i32
  }
  func.func @transform_4(%arg0: i32) -> (i32, i32) {
    %c0_i32 = arith.constant 0 : i32
    %c0_i32_0 = arith.constant 0 : i32
    %c0_i32_1 = arith.constant 0 : i32
    return %c0_i32, %c0_i32_0 : i32, i32
  }
  func.func @transform_5(%arg0: i32) -> (i32, i32) {
    %c0_i32 = arith.constant 0 : i32
    %c0_i32_0 = arith.constant 0 : i32
    %c0_i32_1 = arith.constant 0 : i32
    return %c0_i32, %c0_i32_0 : i32, i32
  }
  func.func @transform_6(%arg0: i32) -> (i32, i32) {
    %c0_i32 = arith.constant 0 : i32
    %c0_i32_0 = arith.constant 0 : i32
    %c0_i32_1 = arith.constant 0 : i32
    return %c0_i32, %c0_i32_0 : i32, i32
  }
  func.func @transform_7(%arg0: i32) -> (i32, i32) {
    %c0_i32 = arith.constant 0 : i32
    %c0_i32_0 = arith.constant 0 : i32
    return %arg0, %c0_i32 : i32, i32
  }
}

</mosaic_0001>

<bundles_post_ra>
// kernel: generator_forward.1
= control target key start
LH: loop header
LB: loop body
LE: loop exit
PB: predicated region body
PF: predicated region fallthrough
CT: control target
= control target key end

     0   :  { %12 = vsyncpa [#allocation3], 0  ;;  %s749_s0 = inlined_call_operand.vmem [shape: bf16[16,10], index: 0, kind: input, shape index: {}]   ;;  %s750_s1 = inlined_call_operand.vmem [shape: bf16[10,128], index: 1, kind: input, shape index: {}]   ;;  %s751_s2 = inlined_call_operand.vmem [shape: f32[1,128], index: 2, kind: input, shape index: {}]   ;;  %s752_s3 = inlined_call_operand.hbm [shape: bf16[128,256], index: 3, kind: input, shape index: {}]   ;;  %s753_s4 = inlined_call_operand.vmem [shape: f32[1,256], index: 4, kind: input, shape index: {}]   ;;  %s754_s5 = inlined_call_operand.hbm [shape: bf16[256,128], index: 5, kind: input, shape index: {}]   ;;  %s755_s6 = inlined_call_operand.vmem [shape: f32[1,128], index: 6, kind: input, shape index: {}]   ;;  %s756_s7 = inlined_call_operand.vmem [shape: bf16[16,128], index: 7, kind: output, shape index: {}]  }
   0x1   :  { %13 = vsyncpa [#allocation5], 0  ;;  %s658_s24 = smov [#allocation2]   ;;  %s610_s28 = scalar_lea.hbm %s752_s3, 2048 }
   0x2   :  { %s25_s25 = sshll.u32 %s658_s24, 4  ;;  %p611_p0 = scmp.ne.s32.totalorder %s752_s3, %s610_s28  ;;  %s26_s25 = int_to_ptr.vmem [resolvable:$true] %s25_s25 }
   0x3   :  { %p614_p1 = scmp.lt.u32.totalorder %s610_s28, %s752_s3 }
   0x5   :  { %p616_p2 = pnand %p614_p1, %p611_p0 }
   0x7   :  { %619 = shalt.err (!%p616_p2)
}
   0x8   :  { %s620_s10 = scalar_lea.vmem %s26_s25, 2048  ;;  %p625_p4 = scmp.lt.s32.totalorder %s26_s25, %s26_s25 }
   0x9   :  { %p621_p3 = scmp.ne.s32.totalorder %s26_s25, %s620_s10  ;;  %p626_p5 = scmp.lt.s32.totalorder %s620_s10, %s620_s10 }
   0xb   :  { %p627_p6 = por %p626_p5, %p625_p4 }
   0xd   :  { %p628_p7 = pnand %p627_p6, %p621_p3 }
   0xf   :  { %631 = shalt.err (!%p628_p7)
}
  0x10   :  { %s659_s11 = smov 128   ;;  %s660_s12 = smov 8  }
  0x11   :  { %31 = dma.hbm_to_vmem [thread:$0]  %s752_s3, 2048, %s26_s25, [#allocation3], %s659_s11, %s659_s11, %s660_s12  }
  0x12   :  { %s661_s15 = smov [#allocation4]   ;;  %s632_s19 = scalar_lea.hbm %s754_s5, 2048 }
  0x13   :  { %s39_s16 = sshll.u32 %s661_s15, 4  ;;  %p633_p8 = scmp.ne.s32.totalorder %s754_s5, %s632_s19  ;;  %s40_s16 = int_to_ptr.vmem [resolvable:$true] %s39_s16 }
  0x14   :  { %p636_p9 = scmp.lt.u32.totalorder %s632_s19, %s754_s5 }
  0x16   :  { %p638_p10 = pnand %p636_p9, %p633_p8 }
  0x18   :  { %641 = shalt.err (!%p638_p10)
}
  0x19   :  { %s642_s24 = scalar_lea.vmem %s40_s16, 2048  ;;  %p647_p12 = scmp.lt.s32.totalorder %s40_s16, %s40_s16 }
  0x1a   :  { %p643_p11 = scmp.ne.s32.totalorder %s40_s16, %s642_s24  ;;  %p648_p13 = scmp.lt.s32.totalorder %s642_s24, %s642_s24 }
  0x1c   :  { %p649_p0 = por %p648_p13, %p647_p12 }
  0x1e   :  { %p650_p1 = pnand %p649_p0, %p643_p11 }
  0x20   :  { %653 = shalt.err (!%p650_p1)
}
  0x21   :  { %s662_s3 = smov 64   ;;  %s663_s25 = smov 4  }
  0x22   :  { %45 = dma.hbm_to_vmem [thread:$0]  %s754_s5, 2048, %s40_s16, [#allocation5], %s662_s3, %s662_s3, %s663_s25  }
  0x23   :  { %654 = dma.done.wait [#allocation3], 2048  }
  0x24   :  { %655 = vsyncadd [#allocation3], 4294965248 }
  0x25   :  { %656 = dma.done.wait [#allocation5], 2048  }
  0x26   :  { %657 = vsyncadd [#allocation5], 4294965248  ;;  %v664_v0 = vmov 0.0   ;;  %vm665_vm0 = vmmov 0   ;;  %vm80_vm1 = vcmask 1044480   ;;  %v565_v2 = vld [vmem:[%s749_s0] sm:$0xff]   ;;  %v146_v47 = vlaneseq }
  0x27   :  { %549 = vmatprep.subr.bf16.mxu0 %v664_v0  ;;  %551 = vmatprep.mubr.msk.bf16.mxu0 %vm665_vm0, %v664_v0  ;;  %v564_v1 = vld [vmem:[%s750_s1] sm:$0x1f]   ;;  %vm76_vm2 = vcmask 80896   ;;  %v569_v6 = vld [vmem:[#allocation2 + $0x14] ss:$8 sps:$4 sm:$0xff]   ;;  %v666_v20 = vmov 0  }
  0x28   :  { %v82_v3 = vsel %vm80_vm1, %v564_v1, 0  ;;  %v566_v4 = vld [vmem:[#allocation2 + $0x4] ss:$8 sps:$4 sm:$0xff]   ;;  %v568_v5 = vld [vmem:[#allocation2] ss:$8 sps:$4 sm:$0xff]   ;;  %268 = vmatprep.mubr.bf16.mxu1 %v666_v20  ;;  %v594_v25 = vld [vmem:[#allocation4 + $0x50] sm:$0xff]  }
  0x29   :  { %550 = vmatpush3.bf16.msra.mxu0 %v82_v3  ;;  %236 = vmatprep.subr.bf16.mxu1 %v566_v4  ;;  %v571_v7 = vld [vmem:[#allocation2 + $0x10] ss:$8 sps:$4 sm:$0xff]   ;;  %v572_v8 = vld [vmem:[#allocation2 + $0x24] ss:$8 sps:$4 sm:$0xff]   ;;  %v574_v9 = vld [vmem:[#allocation2 + $0x20] ss:$8 sps:$4 sm:$0xff]  }
  0x2a   :  { %237 = vmatpush1.bf16.msra.mxu1 %v568_v5  ;;  %v575_v10 = vld [vmem:[#allocation2 + $0x34] ss:$8 sps:$4 sm:$0xff]   ;;  %v577_v11 = vld [vmem:[#allocation2 + $0x30] ss:$8 sps:$4 sm:$0xff]   ;;  %v578_v12 = vld [vmem:[#allocation2 + $0x44] ss:$8 sps:$4 sm:$0xff]  }
  0x2b   :  { %238 = vmatprep.subr.bf16.mxu1 %v569_v6  ;;  %v580_v13 = vld [vmem:[#allocation2 + $0x40] ss:$8 sps:$4 sm:$0xff]   ;;  %v581_v14 = vld [vmem:[#allocation2 + $0x54] ss:$8 sps:$4 sm:$0xff]   ;;  %v583_v15 = vld [vmem:[#allocation2 + $0x50] ss:$8 sps:$4 sm:$0xff]  }
  0x2c   :  { %552 = vmatmul.mubr.msk.bf16.vlgmr.msra.gmra.mrb[0].mxu0 %vm76_vm2, %v565_v2  ;;  %v584_v16 = vld [vmem:[#allocation2 + $0x64] ss:$8 sps:$4 sm:$0xff]   ;;  %v586_v17 = vld [vmem:[#allocation2 + $0x60] ss:$8 sps:$4 sm:$0xff]   ;;  %v587_v18 = vld [vmem:[#allocation2 + $0x74] ss:$8 sps:$4 sm:$0xff]  }
  0x2d   :  { %v589_v19 = vld [vmem:[#allocation2 + $0x70] ss:$8 sps:$4 sm:$0xff]   ;;  %v590_v21 = vld [vmem:[#allocation4 + $0x40] sm:$0xff]   ;;  %v592_v23 = vld [vmem:[#allocation4 + $0x48] sm:$0xff]   ;;  %v147_v48 = vshrl.u32 %v146_v47, 7 }
  0x2e   :  { %239 = vmatpush1.bf16.msra.mxu1 %v571_v7  ;;  %v591_v22 = vld [vmem:[#allocation4] sm:$0xff]   ;;  %527 = vmatprep.subr.bf16.mxu0 %v590_v21  ;;  %v593_v24 = vld [vmem:[#allocation4 + $0x8] sm:$0xff]   ;;  %v595_v26 = vld [vmem:[#allocation4 + $0x10] sm:$0xff]  }
  0x2f   :  { %240 = vmatprep.subr.bf16.mxu1 %v572_v8  ;;  %528 = vmatpush3.bf16.msra.mxu0 %v591_v22  ;;  %v596_v27 = vld [vmem:[#allocation4 + $0x58] sm:$0xff]   ;;  %v598_v29 = vld [vmem:[#allocation4 + $0x60] sm:$0xff]   ;;  %v600_v31 = vld [vmem:[#allocation4 + $0x68] sm:$0xff]   ;;  %v148_v49 = vsub.s32 0, %v147_v48  ;;  %v152_v51 = vsub.s32 1, %v147_v48 }
  0x30   :  { %529 = vmatprep.subr.bf16.mxu0 %v592_v23  ;;  %v597_v28 = vld [vmem:[#allocation4 + $0x18] sm:$0xff]   ;;  %v599_v30 = vld [vmem:[#allocation4 + $0x20] sm:$0xff]   ;;  %v601_v42 = vld [vmem:[#allocation4 + $0x28] sm:$0xff]  }
  0x31   :  { %v479_v32 = vld [vmem:[%s751_s2] ss:$0 sm:$0xff]  ;;  %v602_v43 = vld [vmem:[#allocation4 + $0x70] sm:$0xff]   ;;  %v604_v45 = vld [vmem:[#allocation4 + $0x78] sm:$0xff]  }
  0x32   :  { %241 = vmatpush1.bf16.msra.mxu1 %v574_v9  ;;  %v603_v44 = vld [vmem:[#allocation4 + $0x30] sm:$0xff]   ;;  %v605_v46 = vld [vmem:[#allocation4 + $0x38] sm:$0xff]   ;;  %v144_v50 = vld [vmem:[%s753_s4] sm:$0x3] }
  0x33   :  { %242 = vmatprep.subr.bf16.mxu1 %v575_v10  ;;  %530 = vmatpush3.bf16.msra.mxu0 %v593_v24  ;;  %v149_v52 = vrot.slane %v144_v50, %v148_v49  ;;  %v153_v53 = vrot.slane %v144_v50, %v152_v51  ;;  %v499_v5 = vld [vmem:[%s755_s6] ss:$0 sm:$0xff] }
  0x34   :  { %531 = vmatprep.subr.bf16.mxu0 %v594_v25 }
  0x36   :  { %243 = vmatpush1.bf16.msra.mxu1 %v577_v11 }
  0x37   :  { %244 = vmatprep.subr.bf16.mxu1 %v578_v12  ;;  %532 = vmatpush3.bf16.msra.mxu0 %v595_v26 }
  0x38   :  { %533 = vmatprep.subr.bf16.mxu0 %v596_v27 }
  0x3a   :  { %245 = vmatpush1.bf16.msra.mxu1 %v580_v13 }
  0x3b   :  { %246 = vmatprep.subr.bf16.mxu1 %v581_v14  ;;  %534 = vmatpush3.bf16.msra.mxu0 %v597_v28 }
  0x3c   :  { %535 = vmatprep.subr.bf16.mxu0 %v598_v29 }
  0x3e   :  { %247 = vmatpush1.bf16.msra.mxu1 %v583_v15 }
  0x3f   :  { %248 = vmatprep.subr.bf16.mxu1 %v584_v16  ;;  %536 = vmatpush3.bf16.msra.mxu0 %v599_v30 }
  0x40   :  { %537 = vmatprep.subr.bf16.mxu0 %v600_v31 }
  0x42   :  { %249 = vmatpush1.bf16.msra.mxu1 %v586_v17 }
  0x43   :  { %250 = vmatprep.subr.bf16.mxu1 %v587_v18  ;;  %538 = vmatpush3.bf16.msra.mxu0 %v601_v42 }
  0x44   :  { %539 = vmatprep.subr.bf16.mxu0 %v602_v43 }
  0x46   :  { %251 = vmatpush1.bf16.msra.mxu1 %v589_v19 }
  0x47   :  { %540 = vmatpush3.bf16.msra.mxu0 %v603_v44 }
  0x48   :  { %541 = vmatprep.subr.bf16.mxu0 %v604_v45 }
  0x4b   :  { %542 = vmatpush3.bf16.msra.mxu0 %v605_v46 }
  0xff   :  { %v118_v33 = vpop.f32.mrb[0].mxu0 }
 0x100   :  { %v119_v34 = vadd.f32 %v479_v32, %v118_v33  ;;  %v553_v35 = vpop.f32.mrb[1].mxu0 }
 0x101   :  { %v121_v36 = vpop.f32.mrb[2].mxu0 }
 0x102   :  { %v122_v37 = vadd.f32 %v479_v32, %v121_v36  ;;  %v554_v38 = vpop.f32.mrb[3].mxu0  ;;  %v125_v39 = vmax.f32 %v119_v34, 0.0 }
 0x104   :  { %v126_v40 = vmax.f32 %v122_v37, 0.0 }
 0x106   :  { %v127_v41 = vpack.c.bf16 %v126_v40, %v125_v39 }
 0x108   :  { %269 = vmatmul.mubr.bf16.vlgmr.msra.gmra.mrb[0].mxu1 %v127_v41 }
 0x1db   :  { %v270_v54 = vpop.f32.mrb[0].mxu1 }
 0x1dc   :  { %v271_v55 = vadd.f32 %v270_v54, %v149_v52  ;;  %v272_v56 = vpop.f32.mrb[1].mxu1 }
 0x1dd   :  { %v273_v57 = vadd.f32 %v272_v56, %v153_v53  ;;  %v274_v58 = vpop.f32.mrb[2].mxu1 }
 0x1de   :  { %v275_v59 = vadd.f32 %v274_v58, %v149_v52  ;;  %v276_v60 = vpop.f32.mrb[3].mxu1  ;;  %v279_v62 = vmax.f32 %v271_v55, 0.0 }
 0x1df   :  { %v277_v61 = vadd.f32 %v276_v60, %v153_v53  ;;  %v280_v0 = vmax.f32 %v273_v57, 0.0 }
 0x1e0   :  { %v281_v63 = vmax.f32 %v275_v59, 0.0 }
 0x1e1   :  { %v282_v1 = vmax.f32 %v277_v61, 0.0 }
 0x1e2   :  { %v283_v2 = vpack.c.bf16 %v281_v63, %v279_v62 }
 0x1e3   :  { %v284_v3 = vpack.c.bf16 %v282_v1, %v280_v0 }
 0x1e5   :  { %452 = vmatprep.mubr.bf16.mxu0 %v284_v3 }
 0x1e6   :  { %453 = vmatmul.mubr.bf16.vlgmr.msra.gmra.mrb[4].mxu0 %v283_v2 }
 0x2b9   :  { %v543_v4 = vpop.f32.mrb[4].mxu0 }
 0x2ba   :  { %v544_v6 = vpop.f32.mrb[5].mxu0 }
 0x2bb   :  { %v545_v7 = vadd.f32 %v544_v6, %v543_v4  ;;  %v546_v8 = vpop.f32.mrb[6].mxu0 }
 0x2bc   :  { %v547_v9 = vpop.f32.mrb[7].mxu0 }
 0x2bd   :  { %v455_v10 = vadd.f32 %v545_v7, %v499_v5  ;;  %v548_v11 = vadd.f32 %v547_v9, %v546_v8 }
 0x2bf   :  { %v458_v12 = vadd.f32 %v548_v11, %v499_v5  ;;  %606 = vtanh.f32 %v455_v10 }
 0x2c1   :  { %608 = vtanh.f32 %v458_v12 }
 0x2c9   :  { %v607_v13 = vpop.eup %606 }
 0x2cb   :  { %v609_v14 = vpop.eup %608 }
 0x2cc   :  { %v523_v15 = vpack.c.bf16 %v609_v14, %v607_v13 }
 0x2ce   :  { %524 = vst [vmem:[%s756_s7] sm:$0xff] %v523_v15  }
 0x2cf   :  { %477 = vsyncpa [#allocation3], 1 }
 0x2d0   :  { %478 = vsyncpa [#allocation5], 1 }

</bundles_post_ra>
